<compile_context>
chip_gen: v7x
topology: tpu7x:2x2x1
jax: 0.10.0
libtpu: 0.0.40
codegen_flags: <defaults>
</compile_context>

<pallas_src>
import functools
import math

import jax
import jax.numpy as jnp
from jax.experimental import pallas as pl
from jax.experimental.pallas import tpu as pltpu


def _convblock_kernel(x_ref, gamma_ref, beta_ref, w_ref, b_ref, out_ref, *scratch,
                      L, K, pad, sample_type, approximate_gelu, eps, c_in_dense):
    BB = x_ref.shape[0]                    # samples per grid step
    c_in = x_ref.shape[2]
    c_out = out_ref.shape[2]
    l_out = out_ref.shape[1]

    # Loop-invariant parameter loads (used exactly once each; no per-sample
    # re-broadcast since the whole block is processed at once).
    gamma = gamma_ref[...]                 # (1, C_in)  -> broadcasts over (BB, L, C_in)
    beta = beta_ref[...]                   # (1, C_in)
    w = w_ref[...]                         # (K*C_in, C_out) bf16, residual folded in
    bias = b_ref[...]                      # (1, C_out) f32, residual folded in

    x = x_ref[...].astype(jnp.float32)     # (BB, L, C_in)

    # --- GroupNorm(num_groups == num_channels): per-(sample, channel) stats over L (f32) ---
    mean = jnp.mean(x, axis=1, keepdims=True)
    xc = x - mean
    var = jnp.mean(xc * xc, axis=1, keepdims=True)
    xn = xc * jax.lax.rsqrt(var + eps) * gamma + beta

    # --- GELU ---
    if approximate_gelu:
        # tanh approximation runs on the EUP (separate VLIW slot); recommended
        # default on v5e where exact erf is a long f32 VALU polynomial.
        c0 = math.sqrt(2.0 / math.pi)
        h = 0.5 * xn * (1.0 + jnp.tanh(c0 * (xn + 0.044715 * xn * xn * xn)))
    else:
        # exact erf form = PyTorch nn.GELU() default.
        h = 0.5 * xn * (1.0 + jax.lax.erf(xn * (1.0 / math.sqrt(2.0))))

    # bf16 matmul operand: the default-precision MXU path consumes bf16 anyway,
    # and the narrower im2col operand halves vreg / vld / VMEM pressure.
    h = h.astype(jnp.bfloat16)

    # --- Conv1d (+ folded residual 1x1 conv) ---
    if pad > 0:
        zpad = jnp.zeros((BB, pad, c_in), h.dtype)
        h_pad = jnp.concatenate([zpad, h, zpad], axis=1)       # (BB, L + 2*pad, C_in)
    else:
        h_pad = h

    if c_in_dense:
        # C_in >= 128: skip the lane-axis im2col concat (it multiplies the
        # activation footprint by K for no MXU gain); accumulate K per-tap
        # dots that are already contraction-deep.
        y = jnp.zeros((BB * L, c_out), jnp.float32)
        for k in range(K):
            tap = h_pad[:, k:k + L, :].reshape(BB * L, c_in)
            y = y + jnp.dot(tap, w[k * c_in:(k + 1) * c_in, :],
                            preferred_element_type=jnp.float32)
        y = y + bias
    else:
        # C_in < 128: single im2col matmul per grid step covering ALL samples
        # (M = BB*L fills the MXU feed; one push/pop per step).
        cols = jnp.concatenate([h_pad[:, k:k + L, :] for k in range(K)],
                               axis=-1).reshape(BB * L, K * c_in)
        y = jnp.dot(cols, w, preferred_element_type=jnp.float32) + bias   # (BB*L, C_out)

    # --- optional sampling layer ---
    if sample_type == "maxpool":
        # One scratch store for the whole grid step, then one pair of
        # ref-level strided loads (value-level y[0::2] does not lower reliably
        # on Mosaic).  L is even, so row pairs never cross sample boundaries.
        pool_ref = scratch[0]                                  # (BB*L, C_out) f32
        pool_ref[...] = y
        half = (BB * L) // 2
        pooled = jnp.maximum(pool_ref[pl.ds(0, half, stride=2), :],
                             pool_ref[pl.ds(1, half, stride=2), :])
        out_ref[...] = pooled.reshape(BB, l_out, c_out).astype(out_ref.dtype)
    else:
        # TODO(synk): sample_type == 'upsample' (ConvTranspose1d + nearest Upsample) not implemented.
        out_ref[...] = y.reshape(BB, l_out, c_out).astype(out_ref.dtype)


def _default_vmem_limit_bytes():
    """Generation-aware scoped-VMEM budget: ~half of physical VMEM."""
    cap = 128 * 1024 * 1024
    try:
        info = pltpu.get_tpu_info()
        cap = int(getattr(info, "vmem_capacity_bytes", cap))
    except Exception:
        pass
    # 128 MiB parts (v5e/v6e) -> 64 MiB; 64 MiB parts (v7x) -> 32 MiB.
    return max(32 * 1024 * 1024, min(96 * 1024 * 1024, cap // 2))


def _pick_batch_block(B, L, L_out, C_in, C_out, K, pad, vmem_limit_bytes):
    """Largest divisor of B whose per-step footprint fits the VMEM budget,
    preferring an even grid extent >= 2 (feeds both v7x TensorCores)."""
    budget = vmem_limit_bytes // 2     # headroom for compiler temps / pipelining

    def fits(bb):
        per = (2 * bb * L * C_in * 4                 # x block, double-buffered
               + 2 * bb * L_out * C_out * 4          # out block, double-buffered
               + bb * (L + 2 * pad) * C_in * 2       # padded bf16 activations
               + bb * L * K * C_in * 2               # im2col operand (bf16)
               + 2 * bb * L * C_out * 4              # f32 conv result + pool scratch
               + 2 * K * C_in * C_out * 2)           # weights (bf16)
        return per <= budget

    divisors = [d for d in range(1, B + 1) if B % d == 0]
    fitting = [d for d in divisors if fits(d)] or [1]
    for d in reversed(fitting):
        if (B // d) >= 2 and (B // d) % 2 == 0:
            return d
    for d in reversed(fitting):
        if (B // d) >= 2:
            return d
    return fitting[-1]


def conv_block_forward_nlc(x_nlc, params, *, kernel_size, sample_type="maxpool",
                           batch_block=None, approximate_gelu=False,
                           vmem_limit_bytes=None):
    """Channels-last entry point: x_nlc (B, L, C_in) -> (B, L_out, C_out)."""
    assert sample_type in (None, "maxpool"), \
        "TODO(synk): 'upsample' path (ConvTranspose1d + Upsample) not implemented"
    assert kernel_size % 2 == 1, \
        "even kernel_size with pad=(K-1)//2 changes the output length; only odd K supported"
    B, L, C_in = x_nlc.shape
    K = kernel_size
    pad = (K - 1) // 2
    C_out = params["conv_w"].shape[0]
    if sample_type == "maxpool":
        assert L % 2 == 0, "MaxPool1d(kernel=2, stride=2) path requires even L"
        L_out = L // 2
    else:
        L_out = L

    if vmem_limit_bytes is None:
        vmem_limit_bytes = _default_vmem_limit_bytes()
    if batch_block is None:
        batch_block = _pick_batch_block(B, L, L_out, C_in, C_out, K, pad, vmem_limit_bytes)
    assert B % batch_block == 0, "batch_block must divide the batch size"

    gamma = params["gn_w"].reshape(1, C_in).astype(jnp.float32)
    beta = params["gn_b"].reshape(1, C_in).astype(jnp.float32)

    # Fold the residual 1x1 conv into the conv weights (host-side algebra):
    #   y   = cols @ W_im2col + b_conv
    #   out = y + (y @ Wres + b_res) = cols @ (W_im2col @ (I + Wres)) + b_conv @ (I + Wres) + b_res
    wres = jnp.transpose(params["res_w"][:, :, 0], (1, 0))            # res = y @ wres
    fold = jnp.eye(C_out, dtype=jnp.float32) + wres
    w_im2col = jnp.transpose(params["conv_w"], (2, 1, 0)).reshape(K * C_in, C_out)
    w_fold = jnp.dot(w_im2col, fold,
                     precision=jax.lax.Precision.HIGHEST).astype(jnp.bfloat16)
    b_fold = (jnp.dot(params["conv_b"].reshape(1, C_out), fold,
                      precision=jax.lax.Precision.HIGHEST)
              + params["res_b"].reshape(1, C_out)).astype(jnp.float32)

    kernel = functools.partial(_convblock_kernel, L=L, K=K, pad=pad,
                               sample_type=sample_type,
                               approximate_gelu=approximate_gelu, eps=1e-5,
                               c_in_dense=(C_in >= 128))

    scratch = []
    if sample_type == "maxpool":
        # Per-grid-step pre-pool buffer (covers all batch_block samples).
        scratch.append(pltpu.VMEM((batch_block * L, C_out), jnp.float32))

    # TODO(synk): for production-sized L, add an L-tile grid axis with a (K-1)
    # halo so the per-step VMEM footprint stays under v7x's scoped limit.
    return pl.pallas_call(
        kernel,
        out_shape=jax.ShapeDtypeStruct((B, L_out, C_out), x_nlc.dtype),
        grid_spec=pltpu.PrefetchScalarGridSpec(
            num_scalar_prefetch=0,
            grid=(B // batch_block,),
            in_specs=[
                pl.BlockSpec((batch_block, L, C_in), lambda b: (b, 0, 0)),   # x
                pl.BlockSpec((1, C_in), lambda b: (0, 0)),                   # gn gamma
                pl.BlockSpec((1, C_in), lambda b: (0, 0)),                   # gn beta
                pl.BlockSpec((K * C_in, C_out), lambda b: (0, 0)),           # folded im2col conv weight (bf16)
                pl.BlockSpec((1, C_out), lambda b: (0, 0)),                  # folded bias (f32)
            ],
            out_specs=pl.BlockSpec((batch_block, L_out, C_out), lambda b: (b, 0, 0)),
            scratch_shapes=scratch,
        ),
        compiler_params=pltpu.CompilerParams(
            dimension_semantics=("parallel",),
            vmem_limit_bytes=vmem_limit_bytes,
        ),
    )(x_nlc, gamma, beta, w_fold, b_fold)


def conv_block_forward(x_ncl, params, *, kernel_size, sample_type="maxpool",
                       batch_block=None, approximate_gelu=False,
                       vmem_limit_bytes=None):
    """PyTorch-layout entry point: x_ncl (B, C_in, L) -> (B, C_out, L_out).

    The two transposes exist only to match PyTorch's NCL Conv1d interface; a
    model that keeps activations channels-last should call
    conv_block_forward_nlc directly and skip both HBM round trips.
    """
    out_nlc = conv_block_forward_nlc(
        jnp.transpose(x_ncl, (0, 2, 1)), params, kernel_size=kernel_size,
        sample_type=sample_type, batch_block=batch_block,
        approximate_gelu=approximate_gelu, vmem_limit_bytes=vmem_limit_bytes)
    return jnp.transpose(out_nlc, (0, 2, 1))


def conv_block_reference(x_ncl, params, *, kernel_size, sample_type="maxpool"):
    """Pure-JAX reference replicating the PyTorch forward (NCL layout)."""
    eps = 1e-5
    B, C_in, L = x_ncl.shape
    pad = (kernel_size - 1) // 2
    x = x_ncl.astype(jnp.float32)
    mean = jnp.mean(x, axis=2, keepdims=True)
    var = jnp.mean((x - mean) ** 2, axis=2, keepdims=True)
    xn = (x - mean) / jnp.sqrt(var + eps)
    xn = xn * params["gn_w"][None, :, None] + params["gn_b"][None, :, None]
    h = 0.5 * xn * (1.0 + jax.lax.erf(xn / jnp.sqrt(2.0)))
    y = jax.lax.conv_general_dilated(
        h, params["conv_w"], window_strides=(1,), padding=[(pad, pad)],
        dimension_numbers=("NCH", "OIH", "NCH"),
        precision=jax.lax.Precision.HIGHEST)
    y = y + params["conv_b"][None, :, None]
    res = jax.lax.conv_general_dilated(
        y, params["res_w"], window_strides=(1,), padding=[(0, 0)],
        dimension_numbers=("NCH", "OIH", "NCH"),
        precision=jax.lax.Precision.HIGHEST)
    res = res + params["res_b"][None, :, None]
    y = y + res
    if sample_type == "maxpool":
        y = jnp.max(y.reshape(B, -1, L // 2, 2), axis=-1)
    return y


if __name__ == "__main__":
    B, C_in, C_out, L, K = 4, 4, 8, 16, 5

    key = jax.random.PRNGKey(0)
    ks = jax.random.split(key, 7)
    params = {
        # GroupNorm affine (PyTorch init: weight=1, bias=0 — perturb deterministically)
        "gn_w": 1.0 + 0.1 * jax.random.normal(ks[0], (C_in,), jnp.float32),
        "gn_b": 0.1 * jax.random.normal(ks[1], (C_in,), jnp.float32),
        # Conv1d(C_in, C_out, K) weight/bias
        "conv_w": jax.random.normal(ks[2], (C_out, C_in, K), jnp.float32) / math.sqrt(C_in * K),
        "conv_b": 0.1 * jax.random.normal(ks[3], (C_out,), jnp.float32),
        # residual Conv1d(C_out, C_out, 1) weight/bias
        "res_w": jax.random.normal(ks[4], (C_out, C_out, 1), jnp.float32) / math.sqrt(C_out),
        "res_b": 0.1 * jax.random.normal(ks[5], (C_out,), jnp.float32),
    }
    x = jax.random.normal(ks[6], (B, C_in, L), jnp.float32)     # NCL like PyTorch

    out = jax.block_until_ready(
        conv_block_forward(x, params, kernel_size=K, sample_type="maxpool"))
    ref = conv_block_reference(x, params, kernel_size=K, sample_type="maxpool")

    assert out.shape == (B, C_out, L // 2), out.shape
    # Tolerance accounts for the bf16 MXU operands vs the HIGHEST-precision f32
    # reference (plus the residual fold's different rounding order).
    max_err = float(jnp.max(jnp.abs(out - ref)))
    assert max_err < 5e-2, f"max abs error too large: {max_err}"
    print("KERNEL_OK")
</pallas_src>

<mosaic_0001>
module attributes {stable_mosaic.version = 11 : i64} {
  func.func @_convblock_kernel(%arg0: i32, %arg1: memref<2x16x4xf32, #tpu.memory_space<vmem>>, %arg2: memref<1x4xf32, #tpu.memory_space<vmem>>, %arg3: memref<1x4xf32, #tpu.memory_space<vmem>>, %arg4: memref<20x8xbf16, #tpu.memory_space<vmem>>, %arg5: memref<1x8xf32, #tpu.memory_space<vmem>>, %arg6: memref<2x8x8xf32, #tpu.memory_space<vmem>>, %arg7: memref<32x8xf32, #tpu.memory_space<vmem>>) attributes {dimension_semantics = [#tpu.dimension_semantics<parallel>], iteration_bounds = array<i64: 2>, scalar_prefetch = 0 : i64, scratch_operands = 1 : i64, tpu.core_type = #tpu.core_type<tc>, window_params = [{transform_indices = @transform_0, window_bounds = array<i64: 2, 16, 4>}, {pipeline_mode = #tpu.pipeline_mode<synchronous>, transform_indices = @transform_1, window_bounds = array<i64: 1, 4>}, {pipeline_mode = #tpu.pipeline_mode<synchronous>, transform_indices = @transform_2, window_bounds = array<i64: 1, 4>}, {pipeline_mode = #tpu.pipeline_mode<synchronous>, transform_indices = @transform_3, window_bounds = array<i64: 20, 8>}, {pipeline_mode = #tpu.pipeline_mode<synchronous>, transform_indices = @transform_4, window_bounds = array<i64: 1, 8>}, {transform_indices = @transform_5, window_bounds = array<i64: 2, 8, 8>}]} {
    %c0 = arith.constant 0 : index
    %c0_0 = arith.constant 0 : index
    %0 = vector.load %arg2[%c0, %c0_0] : memref<1x4xf32, #tpu.memory_space<vmem>>, vector<1x4xf32>
    %c0_1 = arith.constant 0 : index
    %c0_2 = arith.constant 0 : index
    %1 = vector.load %arg3[%c0_1, %c0_2] : memref<1x4xf32, #tpu.memory_space<vmem>>, vector<1x4xf32>
    %c0_3 = arith.constant 0 : index
    %c0_4 = arith.constant 0 : index
    %2 = vector.load %arg4[%c0_3, %c0_4] : memref<20x8xbf16, #tpu.memory_space<vmem>>, vector<20x8xbf16>
    %c0_5 = arith.constant 0 : index
    %c0_6 = arith.constant 0 : index
    %3 = vector.load %arg5[%c0_5, %c0_6] : memref<1x8xf32, #tpu.memory_space<vmem>>, vector<1x8xf32>
    %c0_7 = arith.constant 0 : index
    %c0_8 = arith.constant 0 : index
    %c0_9 = arith.constant 0 : index
    %4 = vector.load %arg1[%c0_7, %c0_8, %c0_9] : memref<2x16x4xf32, #tpu.memory_space<vmem>>, vector<2x16x4xf32>
    %cst = arith.constant dense<0.000000e+00> : vector<2x4xf32>
    %5 = vector.multi_reduction <add>, %4, %cst [1] : vector<2x16x4xf32> to vector<2x4xf32>
    %6 = vector.shape_cast %5 : vector<2x4xf32> to vector<2x1x4xf32>
    %cst_10 = arith.constant 1.600000e+01 : f32
    %7 = vector.broadcast %cst_10 : f32 to vector<2x1x4xf32>
    %8 = arith.divf %6, %7 : vector<2x1x4xf32>
    %9 = vector.broadcast %8 : vector<2x1x4xf32> to vector<2x16x4xf32>
    %10 = arith.subf %4, %9 : vector<2x16x4xf32>
    %11 = arith.mulf %10, %10 : vector<2x16x4xf32>
    %cst_11 = arith.constant dense<0.000000e+00> : vector<2x4xf32>
    %12 = vector.multi_reduction <add>, %11, %cst_11 [1] : vector<2x16x4xf32> to vector<2x4xf32>
    %13 = vector.shape_cast %12 : vector<2x4xf32> to vector<2x1x4xf32>
    %cst_12 = arith.constant 1.600000e+01 : f32
    %14 = vector.broadcast %cst_12 : f32 to vector<2x1x4xf32>
    %15 = arith.divf %13, %14 : vector<2x1x4xf32>
    %cst_13 = arith.constant 9.99999974E-6 : f32
    %16 = vector.broadcast %cst_13 : f32 to vector<2x1x4xf32>
    %17 = arith.addf %15, %16 : vector<2x1x4xf32>
    %18 = math.rsqrt %17 : vector<2x1x4xf32>
    %19 = vector.broadcast %18 : vector<2x1x4xf32> to vector<2x16x4xf32>
    %20 = arith.mulf %10, %19 : vector<2x16x4xf32>
    %21 = vector.shape_cast %0 : vector<1x4xf32> to vector<1x1x4xf32>
    %22 = vector.broadcast %21 : vector<1x1x4xf32> to vector<2x16x4xf32>
    %23 = arith.mulf %20, %22 : vector<2x16x4xf32>
    %24 = vector.shape_cast %1 : vector<1x4xf32> to vector<1x1x4xf32>
    %25 = vector.broadcast %24 : vector<1x1x4xf32> to vector<2x16x4xf32>
    %26 = arith.addf %23, %25 : vector<2x16x4xf32>
    %cst_14 = arith.constant 5.000000e-01 : f32
    %27 = vector.broadcast %cst_14 : f32 to vector<2x16x4xf32>
    %28 = arith.mulf %27, %26 : vector<2x16x4xf32>
    %cst_15 = arith.constant 0.707106769 : f32
    %29 = vector.broadcast %cst_15 : f32 to vector<2x16x4xf32>
    %30 = arith.mulf %26, %29 : vector<2x16x4xf32>
    %31 = math.erf %30 : vector<2x16x4xf32>
    %cst_16 = arith.constant 1.000000e+00 : f32
    %32 = vector.broadcast %cst_16 : f32 to vector<2x16x4xf32>
    %33 = arith.addf %32, %31 : vector<2x16x4xf32>
    %34 = arith.mulf %28, %33 : vector<2x16x4xf32>
    %35 = arith.truncf %34 : vector<2x16x4xf32> to vector<2x16x4xbf16>
    %cst_17 = arith.constant 0.000000e+00 : bf16
    %36 = vector.broadcast %cst_17 : bf16 to vector<2x2x4xbf16>
    %37 = tpu.concatenate %36, %35, %36 in 1 : vector<2x2x4xbf16>, vector<2x16x4xbf16>, vector<2x2x4xbf16> -> vector<2x20x4xbf16>
    %38 = vector.extract_strided_slice %37 {offsets = [0, 0, 0], sizes = [2, 16, 4], strides = [1, 1, 1]} : vector<2x20x4xbf16> to vector<2x16x4xbf16>
    %39 = vector.extract_strided_slice %37 {offsets = [0, 1, 0], sizes = [2, 16, 4], strides = [1, 1, 1]} : vector<2x20x4xbf16> to vector<2x16x4xbf16>
    %40 = vector.extract_strided_slice %37 {offsets = [0, 2, 0], sizes = [2, 16, 4], strides = [1, 1, 1]} : vector<2x20x4xbf16> to vector<2x16x4xbf16>
    %41 = vector.extract_strided_slice %37 {offsets = [0, 3, 0], sizes = [2, 16, 4], strides = [1, 1, 1]} : vector<2x20x4xbf16> to vector<2x16x4xbf16>
    %42 = vector.extract_strided_slice %37 {offsets = [0, 4, 0], sizes = [2, 16, 4], strides = [1, 1, 1]} : vector<2x20x4xbf16> to vector<2x16x4xbf16>
    %43 = tpu.concatenate %38, %39, %40, %41, %42 in 2 : vector<2x16x4xbf16>, vector<2x16x4xbf16>, vector<2x16x4xbf16>, vector<2x16x4xbf16>, vector<2x16x4xbf16> -> vector<2x16x20xbf16>
    %44 = vector.shape_cast %43 : vector<2x16x20xbf16> to vector<32x20xbf16>
    %cst_18 = arith.constant dense<0.000000e+00> : vector<32x8xf32>
    %45 = tpu.matmul %44, %2, %cst_18 {dimension_numbers = #tpu.dot_dimension_numbers<[1], [0], [0], [1], [0, 0, 1, 1], [], []>} : vector<32x20xbf16>, vector<20x8xbf16>, vector<32x8xf32> -> vector<32x8xf32>
    %46 = vector.broadcast %3 : vector<1x8xf32> to vector<32x8xf32>
    %47 = arith.addf %45, %46 : vector<32x8xf32>
    %c0_19 = arith.constant 0 : index
    %c0_20 = arith.constant 0 : index
    %48 = vector.load %arg7[%c0_19, %c0_20] : memref<32x8xf32, #tpu.memory_space<vmem>>, vector<32x8xf32>
    tpu.vector_store %arg7[%c0_19, %c0_20], %47 {strides = array<i32>} : memref<32x8xf32, #tpu.memory_space<vmem>>, vector<32x8xf32>,
    %c0_21 = arith.constant 0 : index
    %c0_22 = arith.constant 0 : index
    %49 = tpu.strided_load %arg7[%c0_21, %c0_22] {strides = array<i32: 2, 1>} : memref<32x8xf32, #tpu.memory_space<vmem>>, vector<16x8xf32>
    %c1 = arith.constant 1 : index
    %c0_23 = arith.constant 0 : index
    %50 = tpu.strided_load %arg7[%c1, %c0_23] {strides = array<i32: 2, 1>} : memref<32x8xf32, #tpu.memory_space<vmem>>, vector<16x8xf32>
    %51 = arith.maximumf %49, %50 : vector<16x8xf32>
    %52 = vector.shape_cast %51 : vector<16x8xf32> to vector<2x8x8xf32>
    %c0_24 = arith.constant 0 : index
    %c0_25 = arith.constant 0 : index
    %c0_26 = arith.constant 0 : index
    %53 = vector.load %arg6[%c0_24, %c0_25, %c0_26] : memref<2x8x8xf32, #tpu.memory_space<vmem>>, vector<2x8x8xf32>
    tpu.vector_store %arg6[%c0_24, %c0_25, %c0_26], %52 {strides = array<i32>} : memref<2x8x8xf32, #tpu.memory_space<vmem>>, vector<2x8x8xf32>,
    return
  }
  func.func @transform_0(%arg0: i32) -> (i32, i32, i32) {
    %c0_i32 = arith.constant 0 : i32
    %c0_i32_0 = arith.constant 0 : i32
    %c0_i32_1 = arith.constant 0 : i32
    return %arg0, %c0_i32, %c0_i32_0 : i32, i32, i32
  }
  func.func @transform_1(%arg0: i32) -> (i32, i32) {
    %c0_i32 = arith.constant 0 : i32
    %c0_i32_0 = arith.constant 0 : i32
    %c0_i32_1 = arith.constant 0 : i32
    return %c0_i32, %c0_i32_0 : i32, i32
  }
  func.func @transform_2(%arg0: i32) -> (i32, i32) {
    %c0_i32 = arith.constant 0 : i32
    %c0_i32_0 = arith.constant 0 : i32
    %c0_i32_1 = arith.constant 0 : i32
    return %c0_i32, %c0_i32_0 : i32, i32
  }
  func.func @transform_3(%arg0: i32) -> (i32, i32) {
    %c0_i32 = arith.constant 0 : i32
    %c0_i32_0 = arith.constant 0 : i32
    %c0_i32_1 = arith.constant 0 : i32
    return %c0_i32, %c0_i32_0 : i32, i32
  }
  func.func @transform_4(%arg0: i32) -> (i32, i32) {
    %c0_i32 = arith.constant 0 : i32
    %c0_i32_0 = arith.constant 0 : i32
    %c0_i32_1 = arith.constant 0 : i32
    return %c0_i32, %c0_i32_0 : i32, i32
  }
  func.func @transform_5(%arg0: i32) -> (i32, i32, i32) {
    %c0_i32 = arith.constant 0 : i32
    %c0_i32_0 = arith.constant 0 : i32
    %c0_i32_1 = arith.constant 0 : i32
    return %arg0, %c0_i32, %c0_i32_0 : i32, i32, i32
  }
}

</mosaic_0001>

<bundles_post_ra>
// kernel: tpu_custom_call.1
= control target key start
LH: loop header
LB: loop body
LE: loop exit
PB: predicated region body
PF: predicated region fallthrough
CT: control target
= control target key end

     0   :  { %10 = vsyncpa [#allocation4], 0  ;;  %s1466_s0 = inlined_call_operand.hbm [shape: f32[4,16,4], index: 0, kind: input, shape index: {}]   ;;  %s1467_s1 = inlined_call_operand.hbm [shape: f32[1,4], index: 1, kind: input, shape index: {}]   ;;  %s1468_s2 = inlined_call_operand.hbm [shape: f32[1,4], index: 2, kind: input, shape index: {}]   ;;  %s1469_s3 = inlined_call_operand.hbm [shape: bf16[20,8], index: 3, kind: input, shape index: {}]   ;;  %s1470_s4 = inlined_call_operand.hbm [shape: f32[1,8], index: 4, kind: input, shape index: {}]   ;;  %s1471_s5 = inlined_call_operand.hbm [shape: f32[4,8,8], index: 5, kind: output, shape index: {}]  }
   0x1   :  { %12 = vsyncpa [#allocation4 + $0x1], 0 }
   0x2   :  { %13 = vsyncpa [#allocation7], 0 }
   0x3   :  { %14 = vsyncpa [#allocation10], 0 }
   0x4   :  { %15 = vsyncpa [#allocation5], 0 }
   0x5   :  { %17 = vsyncpa [#allocation5 + $0x1], 0  ;;  %s1146_s18 = smov 0   ;;  %s1148_s19 = smov 0  }
   0x6   :  { %s1150_s20 = smov 0   ;;  %s1152_s21 = smov 0  }
   0x7 LB: > { %s1167_s22 = sadd.s32 4294967295, %s1099_s21   ;;  %s727_s23 = sadd.s32 4294967294, %s1099_s21   ;;  %s1099_s21 = sphi %s1152_s21, %s1494_s21   ;;  %s1095_s20 = sphi %s1150_s20, %s1493_s20   ;;  %s1091_s19 = sphi %s1148_s19, %s1492_s19   ;;  %s1087_s18 = sphi %s1146_s18, %s1491_s18  }
   0x8   : > { %p43_p0 = scmp.ne.s32.totalorder %s1091_s19, %s1087_s18  ;;  %p1472_p1 = scmp.eq.s32.totalorder %s1167_s22, 0 }
   0x9   : > { %p157_p3 = scmp.eq.s32.totalorder %s727_s23, 1  ;;  %p728_p5 = scmp.ge.s32.totalorder %s1099_s21, 1 }
   0xa   : > { %p1176_p4 = por %p1472_p1, %p43_p0  ;;  %p164_p7 = scmp.lt.s32.totalorder %s1099_s21, 3 }
   0xb   : > { %p1181_p6 = por %p157_p3, %p43_p0  ;;  %s1101_s27 = smov [#allocation6]  }
   0xc   : > { %s1475_s24 = scalar_select %p1176_p4, 1, 0 }
   0xd   : > { %s1476_s25 = scalar_select %p1181_p6, 1, 0 }
   0xe   : > { %p1186_p8 = pnand %p728_p5, %p164_p7  ;;  %s177_s28 = sshll.u32 %s1101_s27, 4  ;;  %s178_s28 = int_to_ptr.vmem [resolvable:$true] %s177_s28 }
   0xf   : > { %s1102_s29 = smov [#allocation9]   ;;  %s1103_s7 = smov [#allocation8]  }
  0x10   : > { %s1477_s26 = scalar_select %p1186_p8, 1, 0 }
  0x11   : > { %p793_p10 = pneg %p1186_p8  ;;  %s198_s30 = sshll.u32 %s1102_s29, 4  ;;  %s1199_s30 = int_to_ptr.vmem [resolvable:$true] %s198_s30 }
  0x12   : > { %s1201_s8 = sshll.u32 %s1103_s7, 4  ;;  %s883_s11 = scalar_lea.hbm %s1467_s1, 16  ;;  %s189_s8 = int_to_ptr.vmem [resolvable:$true] %s1201_s8 }
  0x13   : > { %p1195_p11 = pnand %p793_p10, %p1472_p1  ;;  %p884_p12 = scmp.ne.s32.totalorder %s1467_s1, %s883_s11 }
  0x14   : > { %p890_p5 = scmp.lt.u32.totalorder %s883_s11, %s1467_s1 }
  0x15   : > { %p1211_p13 = pneg %p1195_p11 }
  0x17   : > { %p886_p0 = pnand %p1211_p13, %p884_p12 }
  0x19   : > { %p887_p3 = pneg %p886_p0 }
  0x1b   : > { %p892_p7 = pnand %p890_p5, %p887_p3 }
  0x1d   : > { %895 = shalt.err (!%p892_p7)
}
  0x1e   : > { %s896_s17 = scalar_lea.vmem %s178_s28, 16  ;;  %s903_s23 = scalar_lea.vmem %s178_s28, 32 }
  0x1f   : > { %p897_p10 = scmp.ne.s32.totalorder %s178_s28, %s896_s17  ;;  %p904_p2 = scmp.lt.s32.totalorder %s178_s28, %s178_s28 }
  0x20   : > { %p905_p6 = scmp.lt.s32.totalorder %s903_s23, %s896_s17 }
  0x21   : > { %p899_p9 = pnand %p897_p10, %p1211_p13 }
  0x22   : > { %p906_p4 = por %p905_p6, %p904_p2 }
  0x23   : > { %p900_p1 = pneg %p899_p9 }
  0x25   : > { %p907_p8 = pnand %p906_p4, %p900_p1 }
  0x27   : > { %910 = shalt.err (!%p907_p8)
}
  0x28   : > { %796 = dma.hbm_to_vmem [thread:$0]  (!%p1195_p11), %s1467_s1, 16, %s178_s28, [#allocation7]  }
  0x29   : > { %s911_s10 = scalar_lea.hbm %s1469_s3, 192 }
  0x2a   : > { %p912_p9 = scmp.ne.s32.totalorder %s1469_s3, %s911_s10  ;;  %p918_p1 = scmp.lt.u32.totalorder %s911_s10, %s1469_s3 }
  0x2c   : > { %p914_p12 = pnand %p912_p9, %p1211_p13 }
  0x2e   : > { %p915_p2 = pneg %p914_p12 }
  0x30   : > { %p920_p4 = pnand %p918_p1, %p915_p2 }
  0x32   : > { %923 = shalt.err (!%p920_p4)
}
  0x33   : > { %s924_s28 = scalar_lea.vmem %s1199_s30, 192  ;;  %p932_p3 = scmp.lt.s32.totalorder %s1199_s30, %s1199_s30 }
  0x34   : > { %p925_p6 = scmp.ne.s32.totalorder %s1199_s30, %s924_s28  ;;  %p933_p5 = scmp.lt.s32.totalorder %s924_s28, %s924_s28 }
  0x36   : > { %p927_p8 = pnand %p925_p6, %p1211_p13  ;;  %p934_p7 = por %p933_p5, %p932_p3 }
  0x38   : > { %p928_p0 = pneg %p927_p8 }
  0x3a   : > { %p935_p10 = pnand %p934_p7, %p928_p0 }
  0x3c   : > { %938 = shalt.err (!%p935_p10)
}
  0x3d   : > { %s1104_s16 = smov 64   ;;  %s1105_s17 = smov 4  }
  0x3e   : > { %802 = dma.hbm_to_vmem [thread:$0]  (!%p1195_p11), %s1469_s3, 192, %s1199_s30, [#allocation10], %s1104_s16, %s1104_s16, %s1105_s17  }
  0x3f   : > { %s939_s9 = scalar_lea.hbm %s1468_s2, 16 }
  0x40   : > { %p940_p9 = scmp.ne.s32.totalorder %s1468_s2, %s939_s9  ;;  %p946_p1 = scmp.lt.u32.totalorder %s939_s9, %s1468_s2 }
  0x42   : > { %p942_p12 = pnand %p940_p9, %p1211_p13 }
  0x44   : > { %p943_p2 = pneg %p942_p12 }
  0x46   : > { %p948_p4 = pnand %p946_p1, %p943_p2 }
  0x48   : > { %951 = shalt.err (!%p948_p4)
}
  0x49   : > { %s952_s15 = scalar_lea.vmem %s189_s8, 16  ;;  %s959_s30 = scalar_lea.vmem %s189_s8, 32 }
  0x4a   : > { %p953_p6 = scmp.ne.s32.totalorder %s189_s8, %s952_s15  ;;  %p960_p3 = scmp.lt.s32.totalorder %s189_s8, %s189_s8 }
  0x4b   : > { %p961_p5 = scmp.lt.s32.totalorder %s959_s30, %s952_s15 }
  0x4c   : > { %p955_p8 = pnand %p953_p6, %p1211_p13 }
  0x4d   : > { %p962_p7 = por %p961_p5, %p960_p3 }
  0x4e   : > { %p956_p0 = pneg %p955_p8 }
  0x50   : > { %p963_p10 = pnand %p962_p7, %p956_p0 }
  0x52   : > { %966 = shalt.err (!%p963_p10)
}
  0x53   : > { %799 = dma.hbm_to_vmem [thread:$0]  (!%p1195_p11), %s1468_s2, 16, %s189_s8, [#allocation7]  }
  0x54   : > { %s1106_s17 = smov [#allocation11]   ;;  %s967_s7 = scalar_lea.hbm %s1470_s4, 16 }
  0x55   : > { %s212_s23 = sshll.u32 %s1106_s17, 4  ;;  %p968_p9 = scmp.ne.s32.totalorder %s1470_s4, %s967_s7  ;;  %s213_s23 = int_to_ptr.vmem [resolvable:$true] %s212_s23 }
  0x56   : > { %p974_p1 = scmp.lt.u32.totalorder %s967_s7, %s1470_s4 }
  0x57   : > { %p970_p12 = pnand %p968_p9, %p1211_p13 }
  0x59   : > { %p971_p2 = pneg %p970_p12 }
  0x5b   : > { %p976_p4 = pnand %p974_p1, %p971_p2 }
  0x5d   : > { %979 = shalt.err (!%p976_p4)
}
  0x5e   : > { %s980_s8 = scalar_lea.vmem %s213_s23, 16  ;;  %s987_s13 = scalar_lea.vmem %s213_s23, 32 }
  0x5f   : > { %p981_p6 = scmp.ne.s32.totalorder %s213_s23, %s980_s8  ;;  %p988_p3 = scmp.lt.s32.totalorder %s213_s23, %s213_s23 }
  0x60   : > { %p989_p5 = scmp.lt.s32.totalorder %s987_s13, %s980_s8 }
  0x61   : > { %p983_p8 = pnand %p981_p6, %p1211_p13 }
  0x62   : > { %p990_p7 = por %p989_p5, %p988_p3 }
  0x63   : > { %p984_p0 = pneg %p983_p8 }
  0x65   : > { %p991_p10 = pnand %p990_p7, %p984_p0 }
  0x67   : > { %994 = shalt.err (!%p991_p10)
}
  0x68   : > { %805 = dma.hbm_to_vmem [thread:$0]  (!%p1195_p11), %s1470_s4, 16, %s213_s23, [#allocation10]  }
  0x69   : > { %s1288_s14 = sadd.s32 1, %s1099_s21   ;;  %s30_s28 = sadd.s32 1, %s1095_s20 }
  0x6a   : > { %s27_s6 = ssub.s32 %s1099_s21, %s1288_s14  ;;  %p37_p13 = scmp.ne.s32.totalorder %s1095_s20, %s1091_s19 }
  0x6b   : > { %p28_p9 = scmp.eq.s32.totalorder %s27_s6, 0  ;;  %p38_p12 = scmp.eq.s32.totalorder %s1099_s21, 0 }
  0x6c   : > { %p1480_p2 = scmp.eq.s32.totalorder %s1167_s22, 1  ;;  %p818_p4 = scmp.lt.s32.totalorder %s1099_s21, 2 }
  0x6d   : > { %s1304_s17 = scalar_select %p28_p9, %s1095_s20, %s30_s28  }
  0x6e   : > { %p1298_p1 = por %p1480_p2, %p37_p13  ;;  %p39_p6 = por %p38_p12, %p37_p13 }
  0x6f   : > { %s223_s27 = sand.u32 1, %s1095_s20   ;;  %s758_s23 = sshll.u32 %s1099_s21, 9 }
  0x70   : > { %s734_s29 = sshll.u32 %s223_s27, 5  ;;  %s1311_s10 = scalar_lea.hbm %s1466_s0, %s758_s23 }
  0x71   : > { %s227_s11 = scalar_lea.vmem [#allocation3], %s734_s29  ;;  %p1315_p11 = pnand %p818_p4, %p39_p6 }
  0x72   : > { %s235_s12 = sshll.u32 %s227_s11, 4  ;;  %s1319_s13 = scalar_lea.sflag [#allocation4], %s223_s27  ;;  %s1313_s12 = int_to_ptr.vmem [resolvable:$true] %s235_s12 }
  0x73   : > { %s995_s15 = scalar_lea.hbm %s1311_s10, 512  ;;  %p997_p0 = pneg %p1315_p11 }
  0x74   : > { %p996_p8 = scmp.ne.s32.totalorder %s1311_s10, %s995_s15  ;;  %s1000_s6 = scalar_lea.hbm %s1466_s0, 1024 }
  0x75   : > { %p1001_p7 = scmp.lt.u32.totalorder %s1311_s10, %s1466_s0  ;;  %p1002_p10 = scmp.lt.u32.totalorder %s1000_s6, %s995_s15 }
  0x76   : > { %p998_p3 = pnand %p997_p0, %p996_p8  ;;  %p1004_p9 = scmp.lt.u32.totalorder %s995_s15, %s1311_s10 }
  0x77   : > { %p1003_p13 = por %p1002_p10, %p1001_p7 }
  0x78   : > { %p999_p5 = pneg %p998_p3 }
  0x79   : > { %p1005_p12 = por %p1004_p9, %p1003_p13 }
  0x7b   : > { %p1006_p2 = pnand %p1005_p12, %p999_p5 }
  0x7d   : > { %1009 = shalt.err (!%p1006_p2)
}
  0x7e   : > { %s1010_s27 = scalar_lea.vmem %s1313_s12, 512  ;;  %s1107_s7 = smov [#allocation3]  }
  0x7f   : > { %p1011_p4 = scmp.ne.s32.totalorder %s1313_s12, %s1010_s27  ;;  %s1015_s9 = sshll.u32 %s1107_s7, 4  ;;  %s1016_s9 = int_to_ptr.vmem [resolvable:$false] %s1015_s9 }
  0x80   : > { %s1017_s11 = scalar_lea.vmem %s1016_s9, 1024  ;;  %p1018_p3 = scmp.lt.s32.totalorder %s1313_s12, %s1016_s9 }
  0x81   : > { %p1013_p6 = pnand %p1011_p4, %p997_p0  ;;  %p1019_p7 = scmp.lt.s32.totalorder %s1017_s11, %s1010_s27 }
  0x83   : > { %p1014_p8 = pneg %p1013_p6  ;;  %p1020_p10 = por %p1019_p7, %p1018_p3 }
  0x85   : > { %p1021_p13 = pnand %p1020_p10, %p1014_p8 }
  0x87   : > { %1024 = shalt.err (!%p1021_p13)
}
  0x88   : > { %s1108_s15 = smov 128   ;;  %s1109_s30 = smov 8  }
  0x89   : > { %809 = dma.hbm_to_vmem [thread:$0]  (!%p1315_p11), %s1311_s10, 512, %s1313_s12, %s1319_s13, %s1108_s15, %s1108_s15, %s1109_s30  }
  0x8a   : > { %p1483_p0 = scmp.ne.s32.totalorder %s1477_s26, 0 }
  0x8b   : > { %s1350_s28 = sand.u32 (!%p1483_p0), 1, %s1091_s19   ;;  %p1484_p5 = scmp.ne.s32.totalorder (!%p1483_p0), %s1475_s24, 0 }
  0x8c   : > { %247 = sbr.rel (%p1483_p0) target bundleno = 613 (0x265), region = 40  ;;  %s739_s6 = sshll.u32 (!%p1483_p0), %s1350_s28, 5 }
  0x8d   : > { %s250_s29 = scalar_lea.sflag (!%p1483_p0), [#allocation4], %s1350_s28  ;;  %s253_s23 = scalar_lea.vmem (!%p1483_p0), [#allocation3], %s739_s6 }
  0x93   : > { %1070 = dma.done.wait (%p1484_p5), %s250_s29, 512  }
  0x94   : > { %1072 = vsyncadd (%p1484_p5), %s250_s29, 4294966784  ;;  %p1485_p9 = scmp.eq.s32.totalorder %s1167_s22, 0 }
  0x96   : > { %1074 = dma.done.wait (%p1485_p9), [#allocation7], 32   ;;  %p1486_p11 = pmov %p1485_p9 }
  0x97   : > { %p1487_p12 = pmov %p1485_p9 }
  0x98   : > { %1076 = vsyncadd (%p1486_p11), [#allocation7], 4294967264 }
  0x99   : > { %1078 = dma.done.wait (%p1487_p12), [#allocation10], 208   ;;  %p1488_p2 = pmov %p1485_p9 }
  0x9a   : > { %vm309_vm0 = vcmask 31744   ;;  %v305_v0 = vld [vmem:[%s253_s23] sm:$0xff]  ;;  %v306_v1 = vld [vmem:[%s253_s23 + $0x8] sm:$0xff]  ;;  %v307_v3 = vld [vmem:[%s253_s23 + $0x10] sm:$0xff]  ;;  %vm413_vm1 = vcmask 1040384   ;;  %vm450_vm2 = vcmask 1046528  }
  0x9b   : > { %1080 = vsyncadd (%p1488_p2), [#allocation10], 4294967088  ;;  %v310_v2 = vsel %vm309_vm0, %v305_v0, 0.0  ;;  %v308_v4 = vld [vmem:[%s253_s23 + $0x18] sm:$0xff]  ;;  %v311_v5 = vsel %vm309_vm0, %v306_v1, 0.0  ;;  %v319_v6 = vsel %vm309_vm0, %v307_v3, 0.0 }
  0x9c   : > { %v320_v7 = vsel %vm309_vm0, %v308_v4, 0.0  ;;  %v312_v8 = vadd.f32 %v311_v5, %v310_v2  ;;  %v745_v55 = vld [vmem:[#allocation6] ss:$0 sm:$0xff]  ;;  %v746_v59 = vld [vmem:[#allocation8] ss:$0 sm:$0xff]  ;;  %s1110_s24 = smov 8  }
  0x9d   : > { %v321_v9 = vadd.f32 %v320_v7, %v319_v6  ;;  %vm421_vm3 = vsmask.f32 7424  ;;  %vm461_vm4 = vsmask.f32 6400  ;;  %s1111_s26 = smov 4   ;;  %vm484_vm5 = vcmask 1045504  }
  0x9e   : > { %v313_v10 = vrot.slane %v312_v8, 4  ;;  %vm534_vm6 = vcmask 1041408   ;;  %s1112_s10 = smov 12   ;;  %s1113_s12 = smov 16   ;;  %vm499_vm7 = vcmask 64512   ;;  %vm504_vm8 = vcmask 97280  }
  0x9f   : > { %v322_v11 = vrot.slane %v321_v9, 4  ;;  %vm509_vm9 = vcmask 130048   ;;  %vm529_vm10 = vcmask 162816   ;;  %s744_s8 = sshll.u32 %s1350_s28, 4  ;;  %s759_s13 = sshll.u32 %s1167_s22, 8 }
  0xa0   : > { %v314_v12 = vadd.f32 %v313_v10, %v312_v8  ;;  %s295_s27 = scalar_lea.vmem [#allocation12], %s744_s8  ;;  %s1417_s15 = scalar_lea.hbm %s1471_s5, %s759_s13 }
  0xa1   : > { %v323_v13 = vadd.f32 %v322_v11, %v321_v9  ;;  %s616_s7 = sshll.u32 %s295_s27, 4  ;;  %s603_s22 = scalar_lea.sflag [#allocation5], %s1350_s28  ;;  %s1419_s7 = int_to_ptr.vmem [resolvable:$true] %s616_s7 }
  0xa2   : > { %v315_v14 = vrot.slane %v314_v12, 2  ;;  %s1025_s30 = scalar_lea.vmem %s1419_s7, 256  ;;  %s1114_s6 = smov [#allocation12]  }
  0xa3   : > { %v324_v15 = vrot.slane %v323_v13, 2  ;;  %p1026_p4 = scmp.ne.s32.totalorder %s1419_s7, %s1025_s30  ;;  %s1029_s29 = sshll.u32 %s1114_s6, 4  ;;  %s1030_s29 = int_to_ptr.vmem [resolvable:$false] %s1029_s29 }
  0xa4   : > { %v316_v16 = vadd.f32 %v315_v14, %v314_v12  ;;  %s1031_s23 = scalar_lea.vmem %s1030_s29, 512  ;;  %p1032_p3 = scmp.lt.s32.totalorder %s1419_s7, %s1030_s29 }
  0xa5   : > { %v325_v17 = vadd.f32 %v324_v15, %v323_v13  ;;  %p1027_p6 = pnand %p1026_p4, %p1298_p1  ;;  %p1033_p7 = scmp.lt.s32.totalorder %s1031_s23, %s1025_s30 }
  0xa6   : > { %v317_v18 = vrot.slane %v316_v16, 1 }
  0xa7   : > { %v326_v19 = vrot.slane %v325_v17, 1  ;;  %p1028_p8 = pneg %p1027_p6  ;;  %p1034_p10 = por %p1033_p7, %p1032_p3 }
  0xa8   : > { %v318_v20 = vadd.f32 %v317_v18, %v316_v16 }
  0xa9   : > { %v327_v21 = vadd.f32 %v326_v19, %v325_v17  ;;  %p1035_p13 = pnand %p1034_p10, %p1028_p8 }
  0xaa   : > { %v329_v22 = vmul.f32 0.0625, %v318_v20 }
  0xab   : > { %v330_v23 = vmul.f32 0.0625, %v327_v21 }
  0xac   : > { %v331_v24 = vsub.f32 %v305_v0, %v329_v22  ;;  %v332_v25 = vsub.f32 %v306_v1, %v329_v22 }
  0xad   : > { %v333_v26 = vsub.f32 %v307_v3, %v330_v23  ;;  %v334_v27 = vsub.f32 %v308_v4, %v330_v23 }
  0xae   : > { %v335_v28 = vmul.f32 %v331_v24, %v331_v24  ;;  %v336_v29 = vmul.f32 %v332_v25, %v332_v25 }
  0xaf   : > { %v337_v30 = vmul.f32 %v333_v26, %v333_v26  ;;  %v338_v31 = vmul.f32 %v334_v27, %v334_v27 }
  0xb0   : > { %v339_v32 = vsel %vm309_vm0, %v335_v28, 0.0  ;;  %v340_v33 = vsel %vm309_vm0, %v336_v29, 0.0  ;;  %v869_v29 = vld [vmem:[#allocation9] sm:$0xff]  }
  0xb1   : > { %v348_v34 = vsel %vm309_vm0, %v337_v30, 0.0  ;;  %v349_v35 = vsel %vm309_vm0, %v338_v31, 0.0  ;;  %v341_v36 = vadd.f32 %v340_v33, %v339_v32  ;;  %764 = vmatprep.subr.bf16.mxu0 %v869_v29 }
  0xb2   : > { %v350_v37 = vadd.f32 %v349_v35, %v348_v34  ;;  %765 = vmatpush3.bf16.msra.mxu0 %v869_v29 }
  0xb3   : > { %v342_v38 = vrot.slane %v341_v36, 4 }
  0xb4   : > { %v351_v39 = vrot.slane %v350_v37, 4 }
  0xb5   : > { %v343_v40 = vadd.f32 %v342_v38, %v341_v36 }
  0xb6   : > { %v352_v41 = vadd.f32 %v351_v39, %v350_v37 }
  0xb7   : > { %v344_v42 = vrot.slane %v343_v40, 2 }
  0xb8   : > { %v353_v43 = vrot.slane %v352_v41, 2 }
  0xb9   : > { %v345_v44 = vadd.f32 %v344_v42, %v343_v40 }
  0xba   : > { %v354_v45 = vadd.f32 %v353_v43, %v352_v41 }
  0xbb   : > { %v346_v46 = vrot.slane %v345_v44, 1 }
  0xbc   : > { %v355_v47 = vrot.slane %v354_v45, 1 }
  0xbd   : > { %v347_v48 = vadd.f32 %v346_v46, %v345_v44 }
  0xbe   : > { %v356_v49 = vadd.f32 %v355_v47, %v354_v45 }
  0xbf   : > { %v357_v50 = vmul.f32 0.0625, %v347_v48 }
  0xc0   : > { %v358_v51 = vmul.f32 0.0625, %v356_v49 }
  0xc1   : > { %v359_v52 = vadd.f32 1e-05, %v357_v50 }
  0xc2   : > { %v360_v53 = vadd.f32 1e-05, %v358_v51 }
  0xc3   : > { %871 = vrsqrt.f32 %v359_v52 }
  0xc4   : > { %873 = vrsqrt.f32 %v360_v53 }
  0xcd   : > { %v872_v54 = vpop.eup %871 }
  0xce   : > { %v874_v56 = vpop.eup %873  ;;  %v363_v57 = vmul.f32 %v872_v54, %v331_v24  ;;  %v364_v58 = vmul.f32 %v872_v54, %v332_v25 }
  0xcf   : > { %v365_v60 = vmul.f32 %v874_v56, %v333_v26  ;;  %v366_v61 = vmul.f32 %v874_v56, %v334_v27 }
  0xd0   : > { %v373_v62 = vmul.f32 %v745_v55, %v363_v57  ;;  %v374_v63 = vmul.f32 %v745_v55, %v364_v58 }
  0xd1   : > { %v375_v0 = vmul.f32 %v745_v55, %v365_v60  ;;  %v376_v1 = vmul.f32 %v745_v55, %v366_v61 }
  0xd2   : > { %v383_v2 = vadd.f32 %v746_v59, %v373_v62  ;;  %v384_v3 = vadd.f32 %v746_v59, %v374_v63 }
  0xd3   : > { %v385_v4 = vadd.f32 %v746_v59, %v375_v0  ;;  %v386_v5 = vadd.f32 %v746_v59, %v376_v1  ;;  %v870_v0 = vld [vmem:[#allocation9 + $0x8] ss:$0 sps:$4 sm:$0x33]  }
  0xd4   : > { %v391_v6 = vmul.f32 0.70710677, %v383_v2  ;;  %v392_v7 = vmul.f32 0.70710677, %v384_v3  ;;  %v387_v10 = vmul.f32 0.5, %v383_v2  ;;  %v388_v12 = vmul.f32 0.5, %v384_v3  ;;  %772 = vmatprep.subr.msk.bf16.mxu0 %vm534_vm6, %v870_v0 }
  0xd5   : > { %v393_v8 = vmul.f32 0.70710677, %v385_v4  ;;  %v394_v9 = vmul.f32 0.70710677, %v386_v5  ;;  %v389_v15 = vmul.f32 0.5, %v385_v4  ;;  %v390_v18 = vmul.f32 0.5, %v386_v5 }
  0xd6   : > { %875 = verf.f32 %v391_v6 }
  0xd7   : > { %877 = verf.f32 %v392_v7 }
  0xd8   : > { %879 = verf.f32 %v393_v8 }
  0xd9   : > { %881 = verf.f32 %v394_v9  ;;  %v536_v9 = vsel %vm534_vm6, %v870_v0, 0 }
  0xda   : > { %767 = vmatpush3.bf16.msra.mxu0 %v536_v9 }
  0xe0   : > { %v876_v11 = vpop.eup %875 }
  0xe1   : > { %v878_v13 = vpop.eup %877  ;;  %v399_v14 = vadd.f32 1.0, %v876_v11 }
  0xe2   : > { %v880_v16 = vpop.eup %879  ;;  %v400_v17 = vadd.f32 1.0, %v878_v13 }
  0xe3   : > { %v882_v19 = vpop.eup %881  ;;  %v403_v20 = vmul.f32 %v399_v14, %v387_v10  ;;  %v401_v21 = vadd.f32 1.0, %v880_v16 }
  0xe4   : > { %v404_v22 = vmul.f32 %v400_v17, %v388_v12  ;;  %v402_v23 = vadd.f32 1.0, %v882_v19 }
  0xe5   : > { %v405_v24 = vmul.f32 %v401_v21, %v389_v15 }
  0xe6   : > { %v407_v25 = vpack.c.bf16 %v404_v22, %v403_v20  ;;  %v406_v26 = vmul.f32 %v402_v23, %v390_v18 }
  0xe8   : > { %v411_v27 = vrot.slane %v407_v25, 7  ;;  %v408_v28 = vpack.c.bf16 %v406_v26, %v405_v24 }
  0xea   : > { %v1374_v30 = vsel %vm413_vm1, 0, %v411_v27  ;;  %v1376_v31 = vsel %vm413_vm1, %v411_v27, 0  ;;  %v412_v32 = vrot.slane %v408_v28, 7 }
  0xeb   : > { %v451_v33 = vrot.slane %v1374_v30, 1  ;;  %v452_v34 = vrot.slane %v1376_v31, 1  ;;  %v422_v35 = vshrl.u32 %v1374_v30, 16  ;;  %v424_v36 = vshll.u32 %v1374_v30, 16 }
  0xec   : > { %v1382_v37 = vsel %vm413_vm1, 0, %v412_v32  ;;  %v420_v38 = vsel %vm413_vm1, %v412_v32, 0  ;;  %v428_v39 = vshll.u32 %v1376_v31, 16  ;;  %v465_v51 = vshrl.u32 %v1376_v31, 16  ;;  %v747_v32 = vld [vmem:[#allocation11] ss:$0 sm:$0xff] }
  0xed   : > { %v453_v40 = vsel %vm450_vm2, %v451_v33, %v452_v34  ;;  %v454_v41 = vrot.slane %v1382_v37, 1  ;;  %v455_v42 = vrot.slane %v420_v38, 1  ;;  %v426_v43 = vrot.slane %v424_v36, 1 }
  0xee   : > { %457 = vrot.lane.b32.xlu1 %v453_v40, %s1110_s24  ;;  %v430_v44 = vrot.slane %v428_v39, 1  ;;  %v432_v45 = vshrl.u32 %v1382_v37, 16  ;;  %v434_v46 = vshll.u32 %v1382_v37, 16  ;;  %v438_v47 = vshll.u32 %v420_v38, 16 }
  0xef   : > { %v456_v48 = vsel %vm450_vm2, %v454_v41, %v455_v42  ;;  %v427_v49 = vor.u32 %v426_v43, %v422_v35  ;;  %v474_v50 = vshrl.u32 %v420_v38, 16  ;;  %v488_v59 = vrot.slane %v1382_v37, 2 }
  0xf0   : > { %v471_v52 = vrot.slane %v432_v45, 1  ;;  %v472_v53 = vrot.slane %v434_v46, 2  ;;  %v477_v54 = vrot.slane %v438_v47, 2  ;;  %v436_v55 = vrot.slane %v434_v46, 1 }
  0xf1   : > { %v431_v56 = vsel %vm421_vm3, %v427_v49, %v430_v44  ;;  %v476_v57 = vrot.slane %v474_v50, 1  ;;  %v440_v58 = vrot.slane %v438_v47, 1  ;;  %v462_v62 = vrot.slane %v422_v35, 1 }
  0xf2   : > { %459 = vrot.lane.b32.xlu1 %v456_v48, %s1110_s24  ;;  %442 = vrot.lane.b32.xlu0 %v431_v56, %s1111_s26  ;;  %v473_v60 = vor.u32 %v472_v53, %v471_v52  ;;  %v437_v61 = vor.u32 %v436_v55, %v432_v45  ;;  %v463_v63 = vrot.slane %v424_v36, 2  ;;  %v489_v2 = vrot.slane %v420_v38, 2 }
  0xf3   : > { %v478_v1 = vor.u32 %v477_v54, %v476_v57  ;;  %v467_v3 = vrot.slane %v465_v51, 1  ;;  %v468_v4 = vrot.slane %v428_v39, 2  ;;  %v485_v12 = vrot.slane %v1374_v30, 2 }
  0xf4   : > { %v441_v5 = vsel %vm421_vm3, %v437_v61, %v440_v58  ;;  %v464_v6 = vor.u32 %v463_v63, %v462_v62  ;;  %v490_v10 = vsel %vm484_vm5, %v488_v59, %v489_v2  ;;  %v486_v13 = vrot.slane %v1376_v31, 2 }
  0xf5   : > { %v479_v7 = vsel %vm461_vm4, %v473_v60, %v478_v1  ;;  %v469_v8 = vor.u32 %v468_v4, %v467_v3 }
  0xf6   : > { %482 = vrot.lane.b32.xlu1 %v479_v7, %s1112_s10  ;;  %444 = vrot.lane.b32.xlu0 %v441_v5, %s1111_s26  ;;  %v487_v14 = vsel %vm484_vm5, %v485_v12, %v486_v13 }
  0xf7   : > { %v470_v11 = vsel %vm461_vm4, %v464_v6, %v469_v8 }
  0xfa   : > { %493 = vrot.lane.b32.xlu1 %v490_v10, %s1113_s12  ;;  %480 = vrot.lane.b32.xlu0 %v470_v11, %s1112_s10 }
  0xfe   : > { %491 = vrot.lane.b32.xlu0 %v487_v14, %s1113_s12 }
 0x160   : > { %v458_v15 = vpop.permute.xlu1 %457 }
 0x164   : > { %v460_v16 = vpop.permute.xlu1 %459  ;;  %v443_v17 = vpop.permute.xlu0 %442 }
 0x165   : > { %v496_v21 = vsel %vm309_vm0, %v1374_v30, %v443_v17 }
 0x166   : > { %v501_v26 = vsel %vm499_vm7, %v496_v21, %v458_v15 }
 0x168   : > { %v445_v18 = vpop.permute.xlu0 %444  ;;  %v483_v19 = vpop.permute.xlu1 %482 }
 0x169   : > { %v498_v20 = vsel %vm309_vm0, %v1382_v37, %v445_v18 }
 0x16a   : > { %v503_v22 = vsel %vm499_vm7, %v498_v20, %v460_v16 }
 0x16b   : > { %v508_v25 = vsel %vm504_vm8, %v503_v22, %v483_v19 }
 0x16c   : > { %v481_v23 = vpop.permute.xlu0 %480  ;;  %v494_v24 = vpop.permute.xlu1 %493 }
 0x16d   : > { %v506_v27 = vsel %vm504_vm8, %v501_v26, %v481_v23  ;;  %v513_v31 = vsel %vm509_vm9, %v508_v25, %v494_v24 }
 0x170   : > { %v492_v28 = vpop.permute.xlu0 %491 }
 0x171   : > { %v511_v29 = vsel %vm509_vm9, %v506_v27, %v492_v28 }
 0x172   : > { %768 = vmatprep.mubr.msk.bf16.mxu0 %vm529_vm10, %v511_v29 }
 0x173   : > { %769 = vmatmul.mubr.msk.bf16.vlgmr.msra.gmra.mrb[0].mxu0 %vm529_vm10, %v513_v31 }
 0x246   : > { %v770_v30 = vpop.f32.mrb[0].mxu0 }
 0x247   : > { %v581_v33 = vadd.f32 %v770_v30, %v747_v32  ;;  %v572_v34 = vpop.f32.mrb[1].mxu0 }
 0x248   : > { %v573_v35 = vadd.f32 %v747_v32, %v572_v34  ;;  %v771_v36 = vpop.f32.mrb[2].mxu0 }
 0x249   : > { %589 = vst.msk [vmem:[#allocation2 + $0x10] sm:$0xff] %vm499_vm7, %v581_v33  ;;  %v584_v37 = vadd.f32 %v771_v36, %v747_v32  ;;  %v575_v38 = vpop.f32.mrb[3].mxu0 }
 0x24a   : > { %587 = vst.msk [vmem:[#allocation2] sm:$0xff] %vm499_vm7, %v573_v35  ;;  %v576_v39 = vadd.f32 %v747_v32, %v575_v38 }
 0x24b   : > { %590 = vst.msk [vmem:[#allocation2 + $0x18] sm:$0xff] %vm499_vm7, %v584_v37 }
 0x24c   : > { %588 = vst.msk [vmem:[#allocation2 + $0x8] sm:$0xff] %vm499_vm7, %v576_v39 }
 0x252   : > { %v593_v40 = vld [vmem:[#allocation2 + $0x10] ss:$2 sm:$0xff]  ;;  %v597_v41 = vld [vmem:[#allocation2 + $0x11] ss:$2 sm:$0xff] }
 0x253   : > { %v591_v42 = vld [vmem:[#allocation2] ss:$2 sm:$0xff]  ;;  %v595_v43 = vld [vmem:[#allocation2 + $0x1] ss:$2 sm:$0xff]  ;;  %v599_v44 = vmax.f32 %v593_v40, %v597_v41 }
 0x254   : > { %v598_v45 = vmax.f32 %v591_v42, %v595_v43 }
 0x255   : > { %601 = vst.msk [vmem:[%s295_s27 + $0x8] sm:$0xff] %vm499_vm7, %v599_v44 }
 0x256   : > { %600 = vst.msk [vmem:[%s295_s27] sm:$0xff] %vm499_vm7, %v598_v45 }
 0x257   : > { %1038 = shalt.err (!%p1035_p13)
}
 0x258   : > { %s1039_s26 = scalar_lea.hbm %s1417_s15, 256  ;;  %s1043_s8 = scalar_lea.hbm %s1471_s5, 512 }
 0x259   : > { %p1040_p0 = scmp.ne.s32.totalorder %s1417_s15, %s1039_s26  ;;  %p1044_p11 = scmp.lt.u32.totalorder %s1417_s15, %s1471_s5 }
 0x25a   : > { %p1045_p12 = scmp.lt.u32.totalorder %s1043_s8, %s1039_s26  ;;  %p1047_p4 = scmp.lt.u32.totalorder %s1039_s26, %s1417_s15 }
 0x25b   : > { %p1041_p5 = pnand %p1040_p0, %p1298_p1 }
 0x25c   : > { %p1046_p2 = por %p1045_p12, %p1044_p11 }
 0x25d   : > { %p1042_p9 = pneg %p1041_p5 }
 0x25e   : > { %p1048_p6 = por %p1047_p4, %p1046_p2 }
 0x260   : > { %p1049_p8 = pnand %p1048_p6, %p1042_p9 }
 0x262   : > { %1052 = shalt.err (!%p1049_p8)
}
 0x263   : > { %s1115_s9 = smov 128  }
 0x264   : > { %791 = dma.vmem_to_hbm [thread:$0]  (%p1298_p1), %s1419_s7, 256, %s1417_s15, %s603_s22, %s1115_s9, %s1115_s9, %s1110_s24  }
 0x265 PF: > { %s631_s11 = sand.u32 1, %s1087_s18   ;;  %p1489_p3 = scmp.ne.s32.totalorder %s1476_s25, 0 }
 0x266   : > { %p1490_p7 = scmp.ge.s32.totalorder %s1099_s21, 2  ;;  %s632_s30 = scalar_lea.sflag [#allocation5], %s631_s11 }
 0x268   : > { %p811_p10 = pnand %p1490_p7, %p1489_p3 }
 0x26a   : > { %1082 = dma.done.wait (!%p811_p10), %s632_s30, 256  }
 0x26b   : > { %1084 = vsyncadd (!%p811_p10), %s632_s30, 4294967040  ;;  %p20_p13 = scmp.ge.s32.totalorder %s1288_s14, 4   ;;  %s1491_s18 = smov %s1091_s19 }
 0x26c   : > { %s1492_s19 = smov %s1095_s20  ;;  %s1493_s20 = smov %s1304_s17 }
 0x26d   : > { %s1494_s21 = smov %s1288_s14  ;;  %22 = sbr.rel (!%p20_p13) target bundleno = 7 (0x7), region = 104 }
 0x274   :  { %637 = vsyncpa [#allocation4], 1 }
 0x275   :  { %639 = vsyncpa [#allocation4 + $0x1], 1 }
 0x276   :  { %640 = vsyncpa [#allocation7], 1 }
 0x277   :  { %641 = vsyncpa [#allocation10], 1 }
 0x278   :  { %642 = vsyncpa [#allocation5], 1 }
 0x279   :  { %644 = vsyncpa [#allocation5 + $0x1], 1 }

</bundles_post_ra>
